<compile_context>
chip_gen: v6e
topology: v6e:2x2x1
jax: 0.10.0
libtpu: 0.0.40
codegen_flags: <defaults>
</compile_context>

<pallas_src>
import functools

import jax
import jax.numpy as jnp
from jax.experimental import pallas as pl
from jax.experimental.pallas import tpu as pltpu

LANE = 128      # TPU lane width; weight-slab feature dims are padded to this
MAX_TB = 1024   # max batch-tile rows per grid step (keeps VMEM ~2-3 MiB)


def _round_up(x, m):
    return -(-x // m) * m


def _num_tensorcores():
    """2 on v7x (two TensorCores per chip), else 1.  Fallback-safe."""
    try:
        kind = jax.devices()[0].device_kind.lower()
    except Exception:
        return 1
    return 2 if ("v7" in kind or "7x" in kind) else 1


def mlp_kernel(x_ref, w_ref, o_ref, *, input_size, hidden_size, output_size):
    """Fused Linear->ReLU->Linear->ReLU->Linear on one batch tile.

    Weight-slab layout (per layer L, a 128x128 tile):
      rows [0:fan_in)  : W_L  (columns [0:fan_out))
      row  fan_in      : b_L  (columns [0:fan_out))
      everything else  : 0
    Activations carry exact zeros in lanes >= hidden_size, so the bias rows
    parked at sublane `hidden_size` of W2/W3 never leak into the matmuls; the
    biases are added explicitly (and exactly, in f32) on the VPU.
    """
    wdt = w_ref.dtype
    # Full f32 precision for f32 slabs; default single-pass for bf16 slabs.
    prec = jax.lax.Precision.HIGHEST if wdt == jnp.float32 else None

    x = x_ref[...].astype(wdt)                                        # (tb, in)

    # Layer 1: slice the weight rows so the bias row stays out of the matmul.
    w1 = w_ref[0, :input_size, :]                                     # (in, 128)
    b1 = w_ref[0, input_size:input_size + 1, :].astype(jnp.float32)   # (1, 128)
    h = jnp.dot(x, w1, preferred_element_type=jnp.float32, precision=prec) + b1
    h = jnp.maximum(h, 0.0)

    # Layer 2: h lanes >= hidden_size are exactly 0, so W2's bias row (at
    # sublane `hidden_size`) contributes nothing through the matmul.
    b2 = w_ref[1, hidden_size:hidden_size + 1, :].astype(jnp.float32)
    h = jnp.dot(h.astype(wdt), w_ref[1],
                preferred_element_type=jnp.float32, precision=prec) + b2
    h = jnp.maximum(h, 0.0)

    # Layer 3 (no ReLU); only the first output_size lanes are stored to HBM.
    b3 = w_ref[2, hidden_size:hidden_size + 1, :].astype(jnp.float32)
    o = jnp.dot(h.astype(wdt), w_ref[2],
                preferred_element_type=jnp.float32, precision=prec) + b3
    o_ref[...] = o[:, :output_size].astype(o_ref.dtype)


def pack_params(params, dtype=jnp.float32, lane=LANE):
    """Pack (w1,b1,w2,b2,w3,b3) into one lane-dense (3, 128, 128) slab.

    Layer L's tile holds W_L in rows [0:fan_in) and its bias in row fan_in.
    Zero padding keeps the math exact.  dtype=jnp.bfloat16 halves the per-call
    weight DMA on v6e/v7x (at bf16 precision).
    """
    w1, b1 = params["w1"], params["b1"].reshape(-1)
    w2, b2 = params["w2"], params["b2"].reshape(-1)
    w3, b3 = params["w3"], params["b3"].reshape(-1)
    f_in, h = w1.shape
    out = w3.shape[1]
    assert f_in + 1 <= lane and h + 1 <= lane and out <= lane

    W1 = jnp.zeros((lane, lane), jnp.float32)
    W1 = W1.at[:f_in, :h].set(w1).at[f_in, :h].set(b1)
    W2 = jnp.zeros((lane, lane), jnp.float32)
    W2 = W2.at[:h, :h].set(w2).at[h, :h].set(b2)
    W3 = jnp.zeros((lane, lane), jnp.float32)
    W3 = W3.at[:h, :out].set(w3).at[h, :out].set(b3)
    return jnp.stack([W1, W2, W3]).astype(dtype)                  # (3,128,128)


@functools.partial(jax.jit,
                   static_argnames=("input_size", "hidden_size", "output_size"))
def simple_agent_forward_packed(x, w_packed, *, input_size, hidden_size,
                                output_size):
    """x: (B, input_size) float; w_packed: (3, 128, 128) from pack_params."""
    assert input_size + 1 <= LANE and hidden_size + 1 <= LANE
    assert output_size <= LANE
    assert x.shape[1] == input_size

    b = x.shape[0]
    n_cores = _num_tensorcores()
    b8 = _round_up(max(b, 1), 8)                      # sublane-align the batch
    # One tile per TensorCore when it fits; otherwise MAX_TB-row tiles.
    tb = min(_round_up(-(-b8 // n_cores), 8), MAX_TB)
    b_pad = _round_up(b8, tb)
    grid = (b_pad // tb,)

    xp = x.astype(jnp.float32)
    if b_pad != b:                     # tiny: only pads rows of (B, input_size)
        xp = jnp.pad(xp, ((0, b_pad - b), (0, 0)))

    kernel = functools.partial(mlp_kernel, input_size=input_size,
                               hidden_size=hidden_size, output_size=output_size)
    out = pl.pallas_call(
        kernel,
        out_shape=jax.ShapeDtypeStruct((b_pad, output_size), jnp.float32),
        grid=grid,
        in_specs=[
            # Narrow input block: last dim == full array dim (no 128-lane pad).
            pl.BlockSpec((tb, input_size), lambda i: (i, 0)),
            # Weight slab: constant index_map -> fetched once, VMEM-resident.
            pl.BlockSpec((3, LANE, LANE), lambda i: (0, 0, 0)),
        ],
        # Narrow output block: only output_size lanes are ever written to HBM.
        out_specs=pl.BlockSpec((tb, output_size), lambda i: (i, 0)),
        compiler_params=pltpu.CompilerParams(
            dimension_semantics=("parallel",)),       # one tile per TC on v7x
    )(xp, w_packed)

    return out if b_pad == b else out[:b]


def simple_agent_forward(x, params, dtype=jnp.float32):
    """Convenience wrapper: packs weights then runs the fused kernel."""
    return simple_agent_forward_packed(
        x, pack_params(params, dtype=dtype),
        input_size=params["w1"].shape[0],
        hidden_size=params["w1"].shape[1],
        output_size=params["w3"].shape[1])


def init_params(key, input_size=3, hidden_size=32, output_size=3):
    """Deterministic init mimicking nn.Linear's U(-1/sqrt(fan_in), +1/sqrt(fan_in))."""
    ks = jax.random.split(key, 6)

    def linear(kw, kb, fan_in, fan_out):
        bound = 1.0 / jnp.sqrt(fan_in)
        w = jax.random.uniform(kw, (fan_in, fan_out), jnp.float32, -bound, bound)
        b = jax.random.uniform(kb, (1, fan_out), jnp.float32, -bound, bound)
        return w, b

    w1, b1 = linear(ks[0], ks[1], input_size, hidden_size)
    w2, b2 = linear(ks[2], ks[3], hidden_size, hidden_size)
    w3, b3 = linear(ks[4], ks[5], hidden_size, output_size)
    return {"w1": w1, "b1": b1, "w2": w2, "b2": b2, "w3": w3, "b3": b3}


def reference_forward(x, p):
    h1 = jnp.maximum(x @ p["w1"] + p["b1"], 0.0)
    h2 = jnp.maximum(h1 @ p["w2"] + p["b2"], 0.0)
    return h2 @ p["w3"] + p["b3"]


if __name__ == "__main__":
    key = jax.random.PRNGKey(0)
    k_params, k_x, k_x2 = jax.random.split(key, 3)

    input_size, hidden_size, output_size = 3, 32, 3
    params = init_params(k_params, input_size, hidden_size, output_size)

    # Pack once (f32, exact); reuse the slab across calls.
    w_packed = pack_params(params)

    # Small, module-shaped case (single-env step).
    batch = 8
    x = jax.random.normal(k_x, (batch, input_size), jnp.float32)
    out = jax.block_until_ready(simple_agent_forward_packed(
        x, w_packed, input_size=input_size, hidden_size=hidden_size,
        output_size=output_size))
    ref = reference_forward(x, params)
    assert out.shape == (batch, output_size)
    assert jnp.allclose(out, ref, atol=1e-4, rtol=1e-4), "mismatch (B=8, f32)"

    # Larger batch exercising the tiled / per-TensorCore grid path.
    big_batch = 1000
    x2 = jax.random.normal(k_x2, (big_batch, input_size), jnp.float32)
    out2 = jax.block_until_ready(simple_agent_forward_packed(
        x2, w_packed, input_size=input_size, hidden_size=hidden_size,
        output_size=output_size))
    ref2 = reference_forward(x2, params)
    assert out2.shape == (big_batch, output_size)
    assert jnp.allclose(out2, ref2, atol=1e-4, rtol=1e-4), "mismatch (B=1000, f32)"

    # bf16 weight slab (v6e/v7x fast path): halves the per-call weight DMA.
    w_bf16 = pack_params(params, dtype=jnp.bfloat16)
    out3 = jax.block_until_ready(simple_agent_forward_packed(
        x2, w_bf16, input_size=input_size, hidden_size=hidden_size,
        output_size=output_size))
    assert out3.shape == (big_batch, output_size)
    assert jnp.allclose(out3, ref2, atol=5e-2, rtol=5e-2), "mismatch (B=1000, bf16)"

    print("KERNEL_OK")
</pallas_src>

<mosaic_0001>
module attributes {stable_mosaic.version = 11 : i64} {
  func.func @mlp_kernel(%arg0: i32, %arg1: memref<8x3xf32, #tpu.memory_space<vmem>>, %arg2: memref<3x128x128xf32, #tpu.memory_space<vmem>>, %arg3: memref<8x3xf32, #tpu.memory_space<vmem>>) attributes {dimension_semantics = [#tpu.dimension_semantics<parallel>], iteration_bounds = array<i64: 1>, scalar_prefetch = 0 : i64, scratch_operands = 0 : i64, tpu.core_type = #tpu.core_type<tc>, window_params = [{transform_indices = @transform_0, window_bounds = array<i64: 8, 3>}, {pipeline_mode = #tpu.pipeline_mode<synchronous>, transform_indices = @transform_1, window_bounds = array<i64: 3, 128, 128>}, {transform_indices = @transform_2, window_bounds = array<i64: 8, 3>}]} {
    %c0 = arith.constant 0 : index
    %c0_0 = arith.constant 0 : index
    %0 = vector.load %arg1[%c0, %c0_0] : memref<8x3xf32, #tpu.memory_space<vmem>>, vector<8x3xf32>
    %c0_1 = arith.constant 0 : index
    %c0_2 = arith.constant 0 : index
    %c0_3 = arith.constant 0 : index
    %1 = vector.load %arg2[%c0_1, %c0_2, %c0_3] : memref<3x128x128xf32, #tpu.memory_space<vmem>>, vector<1x3x128xf32>
    %2 = vector.shape_cast %1 : vector<1x3x128xf32> to vector<3x128xf32>
    %c0_4 = arith.constant 0 : index
    %c3 = arith.constant 3 : index
    %c0_5 = arith.constant 0 : index
    %3 = vector.load %arg2[%c0_4, %c3, %c0_5] : memref<3x128x128xf32, #tpu.memory_space<vmem>>, vector<1x1x128xf32>
    %4 = vector.shape_cast %3 : vector<1x1x128xf32> to vector<1x128xf32>
    %cst = arith.constant dense<0.000000e+00> : vector<8x128xf32>
    %5 = tpu.matmul %0, %2, %cst {dimension_numbers = #tpu.dot_dimension_numbers<[1], [0], [0], [1], [0, 0, 1, 1], [], []>, precision = #tpu.contract_precision<fp32>} : vector<8x3xf32>, vector<3x128xf32>, vector<8x128xf32> -> vector<8x128xf32>
    %6 = vector.broadcast %4 : vector<1x128xf32> to vector<8x128xf32>
    %7 = arith.addf %5, %6 : vector<8x128xf32>
    %cst_6 = arith.constant 0.000000e+00 : f32
    %8 = vector.broadcast %cst_6 : f32 to vector<8x128xf32>
    %9 = arith.maximumf %7, %8 : vector<8x128xf32>
    %c1 = arith.constant 1 : index
    %c32 = arith.constant 32 : index
    %c0_7 = arith.constant 0 : index
    %10 = vector.load %arg2[%c1, %c32, %c0_7] : memref<3x128x128xf32, #tpu.memory_space<vmem>>, vector<1x1x128xf32>
    %11 = vector.shape_cast %10 : vector<1x1x128xf32> to vector<1x128xf32>
    %c1_8 = arith.constant 1 : index
    %c0_9 = arith.constant 0 : index
    %c0_10 = arith.constant 0 : index
    %12 = vector.load %arg2[%c1_8, %c0_9, %c0_10] : memref<3x128x128xf32, #tpu.memory_space<vmem>>, vector<1x128x128xf32>
    %13 = vector.shape_cast %12 : vector<1x128x128xf32> to vector<128x128xf32>
    %cst_11 = arith.constant dense<0.000000e+00> : vector<8x128xf32>
    %14 = tpu.matmul %9, %13, %cst_11 {dimension_numbers = #tpu.dot_dimension_numbers<[1], [0], [0], [1], [0, 0, 1, 1], [], []>, precision = #tpu.contract_precision<fp32>} : vector<8x128xf32>, vector<128x128xf32>, vector<8x128xf32> -> vector<8x128xf32>
    %15 = vector.broadcast %11 : vector<1x128xf32> to vector<8x128xf32>
    %16 = arith.addf %14, %15 : vector<8x128xf32>
    %cst_12 = arith.constant 0.000000e+00 : f32
    %17 = vector.broadcast %cst_12 : f32 to vector<8x128xf32>
    %18 = arith.maximumf %16, %17 : vector<8x128xf32>
    %c2 = arith.constant 2 : index
    %c32_13 = arith.constant 32 : index
    %c0_14 = arith.constant 0 : index
    %19 = vector.load %arg2[%c2, %c32_13, %c0_14] : memref<3x128x128xf32, #tpu.memory_space<vmem>>, vector<1x1x128xf32>
    %20 = vector.shape_cast %19 : vector<1x1x128xf32> to vector<1x128xf32>
    %c2_15 = arith.constant 2 : index
    %c0_16 = arith.constant 0 : index
    %c0_17 = arith.constant 0 : index
    %21 = vector.load %arg2[%c2_15, %c0_16, %c0_17] : memref<3x128x128xf32, #tpu.memory_space<vmem>>, vector<1x128x128xf32>
    %22 = vector.shape_cast %21 : vector<1x128x128xf32> to vector<128x128xf32>
    %cst_18 = arith.constant dense<0.000000e+00> : vector<8x128xf32>
    %23 = tpu.matmul %18, %22, %cst_18 {dimension_numbers = #tpu.dot_dimension_numbers<[1], [0], [0], [1], [0, 0, 1, 1], [], []>, precision = #tpu.contract_precision<fp32>} : vector<8x128xf32>, vector<128x128xf32>, vector<8x128xf32> -> vector<8x128xf32>
    %24 = vector.broadcast %20 : vector<1x128xf32> to vector<8x128xf32>
    %25 = arith.addf %23, %24 : vector<8x128xf32>
    %26 = vector.extract_strided_slice %25 {offsets = [0, 0], sizes = [8, 3], strides = [1, 1]} : vector<8x128xf32> to vector<8x3xf32>
    %c0_19 = arith.constant 0 : index
    %c0_20 = arith.constant 0 : index
    %27 = vector.load %arg3[%c0_19, %c0_20] : memref<8x3xf32, #tpu.memory_space<vmem>>, vector<8x3xf32>
    tpu.vector_store %arg3[%c0_19, %c0_20], %26 {strides = array<i32>} : memref<8x3xf32, #tpu.memory_space<vmem>>, vector<8x3xf32>,
    return
  }
  func.func @transform_0(%arg0: i32) -> (i32, i32) {
    %c0_i32 = arith.constant 0 : i32
    %c0_i32_0 = arith.constant 0 : i32
    return %arg0, %c0_i32 : i32, i32
  }
  func.func @transform_1(%arg0: i32) -> (i32, i32, i32) {
    %c0_i32 = arith.constant 0 : i32
    %c0_i32_0 = arith.constant 0 : i32
    %c0_i32_1 = arith.constant 0 : i32
    %c0_i32_2 = arith.constant 0 : i32
    return %c0_i32, %c0_i32_0, %c0_i32_1 : i32, i32, i32
  }
  func.func @transform_2(%arg0: i32) -> (i32, i32) {
    %c0_i32 = arith.constant 0 : i32
    %c0_i32_0 = arith.constant 0 : i32
    return %arg0, %c0_i32 : i32, i32
  }
}

</mosaic_0001>

<bundles_post_ra>
// kernel: simple_agent_forward_packed.1
= control target key start
LH: loop header
LB: loop body
LE: loop exit
PB: predicated region body
PF: predicated region fallthrough
CT: control target
= control target key end

     0   :  { %7 = vsyncpa [#allocation3], 0  ;;  %s2516_s9 = smov [#allocation2]   ;;  %s3289_s0 = inlined_call_operand.vmem [shape: f32[8,3], index: 0, kind: input, shape index: {}]   ;;  %s3290_s1 = inlined_call_operand.hbm [shape: f32[3,128,128], index: 1, kind: input, shape index: {}]   ;;  %s3291_s2 = inlined_call_operand.vmem [shape: f32[8,3], index: 2, kind: output, shape index: {}]  }
   0x1   :  { %s15_s10 = sshll.u32 %s2516_s9, 4  ;;  %s16_s10 = int_to_ptr.vmem [resolvable:$true] %s15_s10 }
   0x2   :  { %s2502_s11 = scalar_lea.vmem %s16_s10, 6144  ;;  %p2507_p1 = scmp.lt.s32.totalorder %s16_s10, %s16_s10 }
   0x3   :  { %p2503_p0 = scmp.ne.s32.totalorder %s16_s10, %s2502_s11  ;;  %p2508_p2 = scmp.lt.s32.totalorder %s2502_s11, %s2502_s11 }
   0x5   :  { %p2509_p3 = por %p2508_p2, %p2507_p1 }
   0x7   :  { %p2510_p4 = pnand %p2509_p3, %p2503_p0 }
   0x9   :  { %2513 = shalt.err (!%p2510_p4)
}
   0xa   :  { %s2517_s12 = smov 128   ;;  %s2518_s13 = smov 8  }
   0xb   :  { %21 = dma.hbm_to_vmem [thread:$0]  %s3290_s1, 6144, %s16_s10, [#allocation3], %s2517_s12, %s2517_s12, %s2518_s13  }
   0xc   :  { %2514 = dma.done.wait [#allocation3], 6144  }
   0xd   :  { %2515 = vsyncadd [#allocation3], 4294961152  ;;  %v2519_v0 = vmov 0.0   ;;  %vm2520_vm0 = vmmov 0   ;;  %vm36_vm1 = vcmask 1042432   ;;  %vm32_vm2 = vcmask 23552  }
   0xe   :  { %2039 = vmatprep.subr.mxu0 %v2519_v0  ;;  %2041 = vmatprep.mubr.msk.f32.mxu0 %vm2520_vm0, %v2519_v0  ;;  %v26_v1 = vld [vmem:[#allocation2] sm:$0x7]  ;;  %v504_v3 = vld [vmem:[#allocation2 + $0xf8] sm:$0xff]  ;;  %v503_v6 = vld [vmem:[#allocation2 + $0xf0] sm:$0xff] }
   0xf   :  { %2044 = vmatprep.subr.mxu1 %v2519_v0  ;;  %2046 = vmatprep.mubr.msk.f32.mxu1 %vm2520_vm0, %v2519_v0  ;;  %v25_v2 = vld [vmem:[%s3289_s0] sm:$0xff]  ;;  %v38_v4 = vsel %vm36_vm1, %v26_v1, 0  ;;  %v2551_v9 = vand.u32 4294901760, %v504_v3  ;;  %v502_v10 = vld [vmem:[#allocation2 + $0xe8] sm:$0xff]  ;;  %v2554_v13 = vand.u32 4294901760, %v503_v6  ;;  %v500_v19 = vld [vmem:[#allocation2 + $0xd8] sm:$0xff] }
  0x10   :  { %v34_v5 = vsel %vm32_vm2, %v25_v2, 0  ;;  %v71_v7 = vand.u32 4294901760, %v38_v4  ;;  %v501_v14 = vld [vmem:[#allocation2 + $0xe0] sm:$0xff]  ;;  %v2560_v18 = vand.u32 4294901760, %v502_v10  ;;  %v2567_v24 = vand.u32 4294901760, %v500_v19  ;;  %v499_v25 = vld [vmem:[#allocation2 + $0xd0] sm:$0xff] }
  0x11   :  { %v2549_v8 = vand.u32 4294901760, %v34_v5  ;;  %v2558_v17 = vsub.f32 %v504_v3, %v2551_v9  ;;  %v2563_v22 = vsub.f32 %v503_v6, %v2554_v13  ;;  %v2565_v23 = vand.u32 4294901760, %v501_v14  ;;  %v498_v30 = vld [vmem:[#allocation2 + $0xc8] sm:$0xff]  ;;  %v497_v34 = vld [vmem:[#allocation2 + $0xc0] sm:$0xff]  ;;  %v496_v63 = vld [vmem:[#allocation2 + $0xb8] sm:$0xff] }
  0x12   :  { %2040 = vmatpush3.msra.mxu0 %v71_v7  ;;  %v148_v12 = vsub.f32 %v38_v4, %v71_v7  ;;  %v2571_v29 = vsub.f32 %v502_v10, %v2560_v18  ;;  %v2577_v33 = vand.u32 4294901760, %v499_v25  ;;  %v2588_v37 = vsub.f32 %v500_v19, %v2567_v24  ;;  %v495_v2 = vld [vmem:[#allocation2 + $0xb0] sm:$0xff]  ;;  %v493_v10 = vld [vmem:[#allocation2 + $0xa0] sm:$0xff] }
  0x13   :  { %v107_v11 = vsub.f32 %v34_v5, %v2549_v8  ;;  %2049 = vmatprep.subr.mxu0 %v2519_v0  ;;  %v603_v28 = vand.u32 4294901760, %v2558_v17  ;;  %v610_v31 = vand.u32 4294901760, %v2563_v22  ;;  %v2575_v32 = vsub.f32 %v501_v14, %v2565_v23  ;;  %v494_v5 = vld [vmem:[#allocation2 + $0xa8] sm:$0xff] }
  0x14   :  { %v149_v16 = vand.u32 4294901760, %v148_v12  ;;  %v617_v36 = vand.u32 4294901760, %v2571_v29  ;;  %v2590_v38 = vand.u32 4294901760, %v498_v30  ;;  %v2600_v41 = vsub.f32 %v499_v25, %v2577_v33 }
  0x15   :  { %v108_v15 = vand.u32 4294901760, %v107_v11  ;;  %v604_v35 = vsub.f32 %v2558_v17, %v603_v28  ;;  %v611_v39 = vsub.f32 %v2563_v22, %v610_v31  ;;  %v624_v40 = vand.u32 4294901760, %v2575_v32 }
  0x16   :  { %v150_v21 = vsub.f32 %v148_v12, %v149_v16  ;;  %v2602_v42 = vand.u32 4294901760, %v497_v34  ;;  %v618_v44 = vsub.f32 %v2571_v29, %v617_v36  ;;  %v631_v45 = vand.u32 4294901760, %v2588_v37 }
  0x17   :  { %v109_v20 = vsub.f32 %v107_v11, %v108_v15  ;;  %v605_v43 = vand.u32 4294901760, %v604_v35  ;;  %v2612_v46 = vsub.f32 %v498_v30, %v2590_v38  ;;  %v612_v47 = vand.u32 4294901760, %v611_v39 }
  0x18   :  { %v151_v27 = vand.u32 4294901760, %v150_v21  ;;  %v625_v48 = vsub.f32 %v2575_v32, %v624_v40  ;;  %v638_v49 = vand.u32 4294901760, %v2600_v41  ;;  %v2623_v50 = vsub.f32 %v497_v34, %v2602_v42 }
  0x19   :  { %v110_v26 = vand.u32 4294901760, %v109_v20  ;;  %v619_v51 = vand.u32 4294901760, %v618_v44  ;;  %v632_v52 = vsub.f32 %v2588_v37, %v631_v45  ;;  %v645_v53 = vand.u32 4294901760, %v2612_v46  ;;  %v490_v44 = vld [vmem:[#allocation2 + $0x88] sm:$0xff] }
  0x1a   :  { %2045 = vmatpush3.msra.mxu1 %v151_v27  ;;  %v626_v54 = vand.u32 4294901760, %v625_v48  ;;  %v639_v55 = vsub.f32 %v2600_v41, %v638_v49  ;;  %v652_v56 = vand.u32 4294901760, %v2623_v50  ;;  %v2669_v1 = vand.u32 4294901760, %v496_v63  ;;  %v491_v27 = vld [vmem:[#allocation2 + $0x90] sm:$0xff] }
  0x1b   :  { %2042 = vmatmul.mubr.f32.vlgmr.msra.gmra.mxu0 %v110_v26  ;;  %2047 = vmatmul.mubr.f32.vlgmr.msra.gmra.mxu1 %v2549_v8  ;;  %v633_v57 = vand.u32 4294901760, %v632_v52  ;;  %v646_v58 = vsub.f32 %v2612_v46, %v645_v53  ;;  %v2674_v4 = vand.u32 4294901760, %v495_v2  ;;  %v2712_v39 = vand.u32 4294901760, %v491_v27 }
  0x1c   :  { %2050 = vmatpush3.msra.mxu0 %v148_v12  ;;  %2054 = vmatprep.subr.mxu1 %v2519_v0  ;;  %v640_v59 = vand.u32 4294901760, %v639_v55  ;;  %v653_v60 = vsub.f32 %v2623_v50, %v652_v56  ;;  %v2672_v3 = vsub.f32 %v496_v63, %v2669_v1  ;;  %v2725_v52 = vand.u32 4294901760, %v490_v44  ;;  %v489_v55 = vld [vmem:[#allocation2 + $0x80] sm:$0xff] }
  0x1d   :  { %2051 = vmatprep.mubr.msk.f32.mxu0 %vm2520_vm0, %v2519_v0  ;;  %2055 = vmatpush3.msra.mxu1 %v71_v7  ;;  %v647_v61 = vand.u32 4294901760, %v646_v58 }
  0x1e   :  { %2059 = vmatprep.subr.mxu0 %v2519_v0  ;;  %2056 = vmatprep.mubr.msk.f32.mxu1 %vm2520_vm0, %v2519_v0  ;;  %v654_v62 = vand.u32 4294901760, %v653_v60  ;;  %v659_v6 = vand.u32 4294901760, %v2672_v3  ;;  %v2735_v60 = vand.u32 4294901760, %v489_v55 }
  0x1f   :  { %2052 = vmatmul.mubr.f32.vlgmr.msra.gmra.mxu0 %v107_v11  ;;  %2057 = vmatmul.mubr.f32.vlgmr.msra.gmra.mxu1 %v108_v15  ;;  %v2693_v15 = vand.u32 4294901760, %v493_v10 }
  0x20   :  { %2060 = vmatpush3.msra.mxu0 %v149_v16  ;;  %2064 = vmatprep.subr.mxu1 %v2519_v0  ;;  %v660_v11 = vsub.f32 %v2672_v3, %v659_v6  ;;  %v492_v16 = vld [vmem:[#allocation2 + $0x98] sm:$0xff] }
  0x21   :  { %2061 = vmatprep.mubr.msk.f32.mxu0 %vm2520_vm0, %v2519_v0  ;;  %2065 = vmatpush3.msra.mxu1 %v71_v7  ;;  %v2680_v7 = vsub.f32 %v495_v2, %v2674_v4  ;;  %v2702_v25 = vsub.f32 %v493_v10, %v2693_v15  ;;  %v2705_v26 = vand.u32 4294901760, %v492_v16  ;;  %v2748_v2 = vsub.f32 %v489_v55, %v2735_v60 }
  0x22   :  { %2066 = vmatprep.mubr.msk.f32.mxu1 %vm2520_vm0, %v2519_v0  ;;  %2104 = vmatprep.subr.mxu1 %v2519_v0  ;;  %v661_v19 = vand.u32 4294901760, %v660_v11 }
  0x23   :  { %2062 = vmatmul.mubr.f32.vlgmr.msra.gmra.mxu0 %v2549_v8  ;;  %2067 = vmatmul.mubr.f32.vlgmr.msra.gmra.mxu1 %v2549_v8  ;;  %v2682_v8 = vand.u32 4294901760, %v494_v5  ;;  %v666_v12 = vand.u32 4294901760, %v2680_v7  ;;  %v3296_v35 = vand.u32 4294901760, %v2702_v25 }
  0x24   :  { %2069 = vmatprep.subr.mxu0 %v2519_v0  ;;  %2105 = vmatpush3.msra.mxu1 %v605_v43  ;;  %v2716_v43 = vsub.f32 %v492_v16, %v2705_v26  ;;  %v3292_v16 = vand.u32 4294901760, %v2748_v2 }
  0x25   :  { %2070 = vmatpush3.msra.mxu0 %v2551_v9  ;;  %2106 = vmatprep.subr.mxu1 %v2519_v0  ;;  %v2691_v14 = vsub.f32 %v494_v5, %v2682_v8  ;;  %v667_v20 = vsub.f32 %v2680_v7, %v666_v12  ;;  %v681_v48 = vsub.f32 %v2702_v25, %v3296_v35 }
  0x26   :  { %2071 = vmatprep.subr.mxu0 %v2519_v0  ;;  %2107 = vmatpush3.msra.mxu1 %v612_v47 }
  0x27   :  { %2072 = vmatpush3.msra.mxu0 %v2554_v13  ;;  %2108 = vmatprep.subr.mxu1 %v2519_v0  ;;  %v3297_v21 = vand.u32 4294901760, %v2691_v14  ;;  %v668_v30 = vand.u32 4294901760, %v667_v20  ;;  %v709_v20 = vsub.f32 %v2748_v2, %v3292_v16 }
  0x28   :  { %2073 = vmatprep.subr.mxu0 %v2519_v0  ;;  %2109 = vmatpush3.msra.mxu1 %v619_v51  ;;  %v2723_v51 = vsub.f32 %v491_v27, %v2712_v39 }
  0x29   :  { %2074 = vmatpush3.msra.mxu0 %v2560_v18  ;;  %2110 = vmatprep.subr.mxu1 %v2519_v0  ;;  %v674_v34 = vsub.f32 %v2691_v14, %v3297_v21  ;;  %v710_v27 = vand.u32 4294901760, %v709_v20 }
  0x2a   :  { %2075 = vmatprep.subr.mxu0 %v2519_v0  ;;  %2111 = vmatpush3.msra.mxu1 %v626_v54  ;;  %v3295_v54 = vand.u32 4294901760, %v2716_v43  ;;  %v3294_v58 = vand.u32 4294901760, %v2723_v51 }
  0x2b   :  { %2076 = vmatpush3.msra.mxu0 %v2565_v23  ;;  %2112 = vmatprep.subr.mxu1 %v2519_v0  ;;  %v675_v47 = vand.u32 4294901760, %v674_v34 }
  0x2c   :  { %2077 = vmatprep.subr.mxu0 %v2519_v0  ;;  %2113 = vmatpush3.msra.mxu1 %v633_v57  ;;  %v682_v57 = vand.u32 4294901760, %v681_v48 }
  0x2d   :  { %2078 = vmatpush3.msra.mxu0 %v2567_v24  ;;  %2114 = vmatprep.subr.mxu1 %v2519_v0 }
  0x2e   :  { %2079 = vmatprep.subr.mxu0 %v2519_v0  ;;  %2115 = vmatpush3.msra.mxu1 %v640_v59  ;;  %v2733_v59 = vsub.f32 %v490_v44, %v2725_v52 }
  0x2f   :  { %2080 = vmatpush3.msra.mxu0 %v2577_v33  ;;  %2116 = vmatprep.subr.mxu1 %v2519_v0 }
  0x30   :  { %2081 = vmatprep.subr.mxu0 %v2519_v0  ;;  %2117 = vmatpush3.msra.mxu1 %v647_v61  ;;  %v688_v61 = vsub.f32 %v2716_v43, %v3295_v54  ;;  %v3293_v63 = vand.u32 4294901760, %v2733_v59 }
  0x31   :  { %2082 = vmatpush3.msra.mxu0 %v2590_v38  ;;  %2118 = vmatprep.subr.mxu1 %v2519_v0 }
  0x32   :  { %2083 = vmatprep.subr.mxu0 %v2519_v0  ;;  %2119 = vmatpush3.msra.mxu1 %v654_v62  ;;  %v695_v62 = vsub.f32 %v2723_v51, %v3294_v58  ;;  %v689_v5 = vand.u32 4294901760, %v688_v61  ;;  %v702_v11 = vsub.f32 %v2733_v59, %v3293_v63 }
  0x33   :  { %2084 = vmatpush3.msra.mxu0 %v2602_v42  ;;  %2120 = vmatprep.subr.mxu1 %v2519_v0 }
  0x34   :  { %2085 = vmatprep.subr.mxu0 %v2519_v0  ;;  %2136 = vmatprep.mubr.msk.f32.mxu1 %vm2520_vm0, %v2519_v0  ;;  %v696_v10 = vand.u32 4294901760, %v695_v62 }
  0x35   :  { %2101 = vmatprep.mubr.msk.f32.mxu0 %vm2520_vm0, %v2519_v0  ;;  %2086 = vmatpush3.msra.mxu0 %v2669_v1 }
  0x36   :  { %2087 = vmatprep.subr.mxu0 %v2519_v0  ;;  %2121 = vmatpush3.msra.mxu1 %v661_v19  ;;  %v703_v19 = vand.u32 4294901760, %v702_v11 }
  0x37   :  { %2088 = vmatpush3.msra.mxu0 %v2674_v4  ;;  %2122 = vmatprep.subr.mxu1 %v2519_v0 }
  0x38   :  { %2089 = vmatprep.subr.mxu0 %v2519_v0  ;;  %2123 = vmatpush3.msra.mxu1 %v668_v30  ;;  %v1820_v30 = vld [vmem:[#allocation2 + $0x3] ss:$0 sm:$0xff] }
  0x39   :  { %2090 = vmatpush3.msra.mxu0 %v2682_v8  ;;  %2124 = vmatprep.subr.mxu1 %v2519_v0 }
  0x3a   :  { %2091 = vmatprep.subr.mxu0 %v2519_v0  ;;  %2125 = vmatpush3.msra.mxu1 %v675_v47 }
  0x3b   :  { %2092 = vmatpush3.msra.mxu0 %v2693_v15  ;;  %2126 = vmatprep.subr.mxu1 %v2519_v0 }
  0x3c   :  { %2093 = vmatprep.subr.mxu0 %v2519_v0  ;;  %2127 = vmatpush3.msra.mxu1 %v682_v57 }
  0x3d   :  { %2094 = vmatpush3.msra.mxu0 %v2705_v26  ;;  %2128 = vmatprep.subr.mxu1 %v2519_v0 }
  0x3e   :  { %2095 = vmatprep.subr.mxu0 %v2519_v0  ;;  %2129 = vmatpush3.msra.mxu1 %v689_v5 }
  0x3f   :  { %2096 = vmatpush3.msra.mxu0 %v2712_v39  ;;  %2130 = vmatprep.subr.mxu1 %v2519_v0 }
  0x40   :  { %2097 = vmatprep.subr.mxu0 %v2519_v0  ;;  %2131 = vmatpush3.msra.mxu1 %v696_v10 }
  0x41   :  { %2098 = vmatpush3.msra.mxu0 %v2725_v52  ;;  %2132 = vmatprep.subr.mxu1 %v2519_v0 }
  0x42   :  { %2099 = vmatprep.subr.mxu0 %v2519_v0  ;;  %2133 = vmatpush3.msra.mxu1 %v703_v19 }
  0x43   :  { %2100 = vmatpush3.msra.mxu0 %v2735_v60  ;;  %2134 = vmatprep.subr.mxu1 %v2519_v0 }
  0x44   :  { %2139 = vmatprep.subr.mxu0 %v2519_v0  ;;  %2135 = vmatpush3.msra.mxu1 %v710_v27 }
  0x45   :  { %2174 = vmatprep.subr.mxu1 %v2519_v0 }
  0xdb   :  { %v112_v34 = vpop.f32.mrf.mxu0  ;;  %v188_v47 = vpop.f32.mrf.mxu1 }
  0xdc   :  { %v113_v44 = vadd.f32 %v1820_v30, %v112_v34 }
  0xdd   :  { %v2043_v48 = vpop.f32.mrf.mxu0  ;;  %v2048_v57 = vpop.f32.mrf.mxu1 }
  0xde   :  { %v189_v55 = vadd.f32 %v188_v47, %v113_v44  ;;  %v1160_v57 = vld [vmem:[#allocation2 + $0x138] sm:$0xff] }
  0xdf   :  { %v262_v61 = vpop.f32.mrf.mxu0  ;;  %v336_v5 = vpop.f32.mrf.mxu1 }
  0xe0   :  { %v263_v62 = vadd.f32 %v262_v61, %v189_v55 }
  0xe1   :  { %v2053_v10 = vpop.f32.mrf.mxu0  ;;  %v2058_v16 = vpop.f32.mrf.mxu1 }
  0xe2   :  { %v337_v11 = vadd.f32 %v336_v5, %v263_v62  ;;  %v3021_v5 = vand.u32 4294901760, %v1160_v57  ;;  %v1159_v10 = vld [vmem:[#allocation2 + $0x130] sm:$0xff] }
  0xe3   :  { %v410_v20 = vpop.f32.mrf.mxu0  ;;  %v482_v63 = vpop.f32.mrf.mxu1 }
  0xe4   :  { %v411_v19 = vadd.f32 %v410_v20, %v337_v11  ;;  %v3027_v20 = vsub.f32 %v1160_v57, %v3021_v5 }
  0xe5   :  { %v2063_v58 = vpop.f32.mrf.mxu0  ;;  %v2068_v54 = vpop.f32.mrf.mxu1 }
  0xe6   :  { %v483_v27 = vadd.f32 %v482_v63, %v411_v19  ;;  %v3029_v19 = vand.u32 4294901760, %v1159_v10 }
  0xe8   :  { %v486_v35 = vmax.f32 %v483_v27, 0.0  ;;  %v1158_v27 = vld [vmem:[#allocation2 + $0x128] sm:$0xff] }
  0xea   :  { %v2765_v21 = vand.u32 4294901760, %v486_v35 }
  0xec   :  { %v2768_v30 = vsub.f32 %v486_v35, %v2765_v21  ;;  %2137 = vmatmul.mubr.f32.vlgmr.msra.gmra.mxu1 %v2765_v21 }
  0xed   :  { %2175 = vmatpush3.msra.mxu1 %v2551_v9  ;;  %2206 = vmatprep.mubr.msk.f32.mxu1 %vm2520_vm0, %v2519_v0 }
  0xee   :  { %v592_v16 = vand.u32 4294901760, %v2768_v30  ;;  %2176 = vmatprep.subr.mxu1 %v2519_v0 }
  0xef   :  { %2177 = vmatpush3.msra.mxu1 %v2554_v13 }
  0xf0   :  { %v593_v54 = vsub.f32 %v2768_v30, %v592_v16  ;;  %2178 = vmatprep.subr.mxu1 %v2519_v0 }
  0xf1   :  { %2179 = vmatpush3.msra.mxu1 %v2560_v18 }
  0xf2   :  { %2180 = vmatprep.subr.mxu1 %v2519_v0  ;;  %v594_v35 = vand.u32 4294901760, %v593_v54  ;;  %v3036_v54 = vsub.f32 %v1159_v10, %v3029_v19 }
  0xf3   :  { %2181 = vmatpush3.msra.mxu1 %v2565_v23 }
  0xf4   :  { %2182 = vmatprep.subr.mxu1 %v2519_v0  ;;  %2102 = vmatmul.mubr.f32.vlgmr.msra.gmra.mxu0 %v594_v35  ;;  %v3038_v35 = vand.u32 4294901760, %v1158_v27 }
  0xf5   :  { %2140 = vmatpush3.msra.mxu0 %v2558_v17  ;;  %2183 = vmatpush3.msra.mxu1 %v2567_v24  ;;  %v3306_v17 = vand.u32 4294901760, %v2716_v43 }
  0xf6   :  { %2141 = vmatprep.subr.mxu0 %v2519_v0  ;;  %2184 = vmatprep.subr.mxu1 %v2519_v0 }
  0xf7   :  { %2142 = vmatpush3.msra.mxu0 %v2563_v22  ;;  %2185 = vmatpush3.msra.mxu1 %v2577_v33  ;;  %v3308_v22 = vand.u32 4294901760, %v2733_v59 }
  0xf8   :  { %2143 = vmatprep.subr.mxu0 %v2519_v0  ;;  %2186 = vmatprep.subr.mxu1 %v2519_v0 }
  0xf9   :  { %2144 = vmatpush3.msra.mxu0 %v2571_v29  ;;  %2187 = vmatpush3.msra.mxu1 %v2590_v38  ;;  %v1167_v29 = vld [vmem:[#allocation2 + $0x170] sm:$0xff] }
  0xfa   :  { %2145 = vmatprep.subr.mxu0 %v2519_v0  ;;  %2188 = vmatprep.subr.mxu1 %v2519_v0 }
  0xfb   :  { %2146 = vmatpush3.msra.mxu0 %v2575_v32  ;;  %2189 = vmatpush3.msra.mxu1 %v2602_v42  ;;  %v2937_v32 = vand.u32 4294901760, %v1167_v29 }
  0xfc   :  { %2147 = vmatprep.subr.mxu0 %v2519_v0  ;;  %2190 = vmatprep.subr.mxu1 %v2519_v0 }
  0xfd   :  { %2148 = vmatpush3.msra.mxu0 %v2588_v37  ;;  %2191 = vmatpush3.msra.mxu1 %v2669_v1  ;;  %v1164_v37 = vld [vmem:[#allocation2 + $0x158] sm:$0xff] }
  0xfe   :  { %2149 = vmatprep.subr.mxu0 %v2519_v0  ;;  %2192 = vmatprep.subr.mxu1 %v2519_v0 }
  0xff   :  { %2150 = vmatpush3.msra.mxu0 %v2600_v41  ;;  %2193 = vmatpush3.msra.mxu1 %v2674_v4  ;;  %v2944_v41 = vand.u32 4294901760, %v1164_v37 }
 0x100   :  { %2151 = vmatprep.subr.mxu0 %v2519_v0  ;;  %2194 = vmatprep.subr.mxu1 %v2519_v0 }
 0x101   :  { %2152 = vmatpush3.msra.mxu0 %v2612_v46  ;;  %2195 = vmatpush3.msra.mxu1 %v2682_v8  ;;  %v1161_v46 = vld [vmem:[#allocation2 + $0x140] sm:$0xff] }
 0x102   :  { %2153 = vmatprep.subr.mxu0 %v2519_v0  ;;  %2196 = vmatprep.subr.mxu1 %v2519_v0 }
 0x103   :  { %2154 = vmatpush3.msra.mxu0 %v2623_v50  ;;  %2197 = vmatpush3.msra.mxu1 %v2693_v15  ;;  %v2949_v50 = vsub.f32 %v1167_v29, %v2937_v32 }
 0x104   :  { %2155 = vmatprep.subr.mxu0 %v2519_v0  ;;  %2198 = vmatprep.subr.mxu1 %v2519_v0 }
 0x105   :  { %2156 = vmatpush3.msra.mxu0 %v2672_v3  ;;  %2199 = vmatpush3.msra.mxu1 %v2705_v26 }
 0x106   :  { %2157 = vmatprep.subr.mxu0 %v2519_v0  ;;  %2200 = vmatprep.subr.mxu1 %v2519_v0 }
 0x107   :  { %2158 = vmatpush3.msra.mxu0 %v2680_v7  ;;  %2201 = vmatpush3.msra.mxu1 %v2712_v39 }
 0x108   :  { %2159 = vmatprep.subr.mxu0 %v2519_v0  ;;  %2202 = vmatprep.subr.mxu1 %v2519_v0 }
 0x109   :  { %2160 = vmatpush3.msra.mxu0 %v2691_v14  ;;  %2203 = vmatpush3.msra.mxu1 %v2725_v52 }
 0x10a   :  { %2161 = vmatprep.subr.mxu0 %v2519_v0  ;;  %2204 = vmatprep.subr.mxu1 %v2519_v0 }
 0x10b   :  { %2162 = vmatpush3.msra.mxu0 %v2702_v25  ;;  %2205 = vmatpush3.msra.mxu1 %v2735_v60 }
 0x10c   :  { %2163 = vmatprep.subr.mxu0 %v2519_v0  ;;  %2207 = vmatmul.mubr.f32.vlgmr.msra.gmra.mxu1 %v592_v16  ;;  %v1323_v16 = vand.u32 4294901760, %v3027_v20 }
 0x10d   :  { %2244 = vmatprep.subr.mxu1 %v2519_v0  ;;  %2164 = vmatpush3.msra.mxu0 %v2716_v43 }
 0x10e   :  { %2245 = vmatpush3.msra.mxu1 %v2551_v9  ;;  %2165 = vmatprep.subr.mxu0 %v2519_v0  ;;  %v3304_v9 = vand.u32 4294901760, %v2691_v14 }
 0x10f   :  { %2246 = vmatprep.subr.mxu1 %v2519_v0  ;;  %2166 = vmatpush3.msra.mxu0 %v2723_v51 }
 0x110   :  { %2247 = vmatpush3.msra.mxu1 %v2554_v13  ;;  %2167 = vmatprep.subr.mxu0 %v2519_v0  ;;  %v3305_v13 = vand.u32 4294901760, %v2702_v25 }
 0x111   :  { %2248 = vmatprep.subr.mxu1 %v2519_v0  ;;  %2168 = vmatpush3.msra.mxu0 %v2733_v59 }
 0x112   :  { %2249 = vmatpush3.msra.mxu1 %v2560_v18  ;;  %2169 = vmatprep.subr.mxu0 %v2519_v0  ;;  %v3307_v18 = vand.u32 4294901760, %v2723_v51 }
 0x113   :  { %2250 = vmatprep.subr.mxu1 %v2519_v0  ;;  %2170 = vmatpush3.msra.mxu0 %v2748_v2 }
 0x114   :  { %2171 = vmatprep.mubr.msk.f32.mxu0 %vm2520_vm0, %v2519_v0  ;;  %2251 = vmatpush3.msra.mxu1 %v2565_v23  ;;  %v3309_v23 = vand.u32 4294901760, %v2748_v2 }
 0x115   :  { %2172 = vmatmul.mubr.f32.vlgmr.msra.gmra.mxu0 %v2768_v30  ;;  %2209 = vmatprep.subr.mxu0 %v2519_v0 }
 0x116   :  { %2252 = vmatprep.subr.mxu1 %v2519_v0  ;;  %2210 = vmatpush3.msra.mxu0 %v603_v28 }
 0x117   :  { %2253 = vmatpush3.msra.mxu1 %v2567_v24  ;;  %2211 = vmatprep.subr.mxu0 %v2519_v0  ;;  %v1168_v24 = vld [vmem:[#allocation2 + $0x178] sm:$0xff] }
 0x118   :  { %2254 = vmatprep.subr.mxu1 %v2519_v0  ;;  %2212 = vmatpush3.msra.mxu0 %v610_v31  ;;  %v2932_v28 = vand.u32 4294901760, %v1168_v24 }
 0x119   :  { %2255 = vmatpush3.msra.mxu1 %v2577_v33  ;;  %2213 = vmatprep.subr.mxu0 %v2519_v0  ;;  %v1166_v33 = vld [vmem:[#allocation2 + $0x168] sm:$0xff] }
 0x11a   :  { %2256 = vmatprep.subr.mxu1 %v2519_v0  ;;  %2214 = vmatpush3.msra.mxu0 %v617_v36  ;;  %v2935_v31 = vsub.f32 %v1168_v24, %v2932_v28  ;;  %v1165_v36 = vld [vmem:[#allocation2 + $0x160] sm:$0xff] }
 0x11b   :  { %2257 = vmatpush3.msra.mxu1 %v2590_v38  ;;  %2215 = vmatprep.subr.mxu0 %v2519_v0  ;;  %v2940_v38 = vand.u32 4294901760, %v1166_v33 }
 0x11c   :  { %2258 = vmatprep.subr.mxu1 %v2519_v0  ;;  %2216 = vmatpush3.msra.mxu0 %v624_v40  ;;  %v2942_v40 = vand.u32 4294901760, %v1165_v36 }
 0x11d   :  { %2259 = vmatpush3.msra.mxu1 %v2602_v42  ;;  %2217 = vmatprep.subr.mxu0 %v2519_v0  ;;  %v1163_v42 = vld [vmem:[#allocation2 + $0x150] sm:$0xff] }
 0x11e   :  { %2260 = vmatprep.subr.mxu1 %v2519_v0  ;;  %2218 = vmatpush3.msra.mxu0 %v631_v45  ;;  %v1162_v45 = vld [vmem:[#allocation2 + $0x148] sm:$0xff]  ;;  %v2960_v3 = vsub.f32 %v1165_v36, %v2942_v40 }
 0x11f   :  { %2261 = vmatpush3.msra.mxu1 %v2669_v1  ;;  %2219 = vmatprep.subr.mxu0 %v2519_v0  ;;  %v2957_v1 = vsub.f32 %v1166_v33, %v2940_v38 }
 0x120   :  { %2262 = vmatprep.subr.mxu1 %v2519_v0  ;;  %2220 = vmatpush3.msra.mxu0 %v638_v49  ;;  %v1267_v49 = vand.u32 4294901760, %v2935_v31 }
 0x121   :  { %2263 = vmatpush3.msra.mxu1 %v2674_v4  ;;  %2221 = vmatprep.subr.mxu0 %v2519_v0  ;;  %v2963_v4 = vsub.f32 %v1164_v37, %v2944_v41 }
 0x122   :  { %2264 = vmatprep.subr.mxu1 %v2519_v0  ;;  %2222 = vmatpush3.msra.mxu0 %v645_v53  ;;  %v2952_v53 = vand.u32 4294901760, %v1163_v42  ;;  %v1268_v7 = vsub.f32 %v2935_v31, %v1267_v49 }
 0x123   :  { %2265 = vmatpush3.msra.mxu1 %v2682_v8  ;;  %2223 = vmatprep.subr.mxu0 %v2519_v0  ;;  %v1274_v8 = vand.u32 4294901760, %v2949_v50  ;;  %v1295_v25 = vand.u32 4294901760, %v2963_v4 }
 0x124   :  { %2266 = vmatprep.subr.mxu1 %v2519_v0  ;;  %2224 = vmatpush3.msra.mxu0 %v652_v56  ;;  %v2954_v56 = vand.u32 4294901760, %v1162_v45 }
 0x125   :  { %2267 = vmatpush3.msra.mxu1 %v2693_v15  ;;  %2225 = vmatprep.subr.mxu0 %v2519_v0  ;;  %v1281_v15 = vand.u32 4294901760, %v2957_v1 }
 0x126   :  { %2268 = vmatprep.subr.mxu1 %v2519_v0  ;;  %2226 = vmatpush3.msra.mxu0 %v659_v6  ;;  %v2966_v6 = vand.u32 4294901760, %v1161_v46  ;;  %v2977_v14 = vsub.f32 %v1162_v45, %v2954_v56 }
 0x127   :  { %2269 = vmatpush3.msra.mxu1 %v2705_v26  ;;  %2227 = vmatprep.subr.mxu0 %v2519_v0  ;;  %v1269_v26 = vand.u32 4294901760, %v1268_v7 }
 0x128   :  { %2270 = vmatprep.subr.mxu1 %v2519_v0  ;;  %2228 = vmatpush3.msra.mxu0 %v666_v12  ;;  %v2973_v12 = vsub.f32 %v1163_v42, %v2952_v53  ;;  %v2989_v51 = vsub.f32 %v1161_v46, %v2966_v6  ;;  %v1309_v63 = vand.u32 4294901760, %v2977_v14  ;;  %v1155_v42 = vld [vmem:[#allocation2 + $0x110] sm:$0xff] }
 0x129   :  { %2271 = vmatpush3.msra.mxu1 %v2712_v39  ;;  %2229 = vmatprep.subr.mxu0 %v2519_v0  ;;  %v1275_v39 = vsub.f32 %v2949_v50, %v1274_v8 }
 0x12a   :  { %2272 = vmatprep.subr.mxu1 %v2519_v0  ;;  %2230 = vmatpush3.msra.mxu0 %v3304_v9  ;;  %v1302_v43 = vand.u32 4294901760, %v2973_v12  ;;  %v1316_v47 = vand.u32 4294901760, %v2989_v51  ;;  %v1310_v55 = vsub.f32 %v2977_v14, %v1309_v63  ;;  %v1157_v9 = vld [vmem:[#allocation2 + $0x120] sm:$0xff] }
 0x12b   :  { %2273 = vmatpush3.msra.mxu1 %v2725_v52  ;;  %2231 = vmatprep.subr.mxu0 %v2519_v0  ;;  %v1282_v52 = vsub.f32 %v2957_v1, %v1281_v15  ;;  %v1276_v59 = vand.u32 4294901760, %v1275_v39 }
 0x12c   :  { %2274 = vmatprep.subr.mxu1 %v2519_v0  ;;  %2232 = vmatpush3.msra.mxu0 %v3305_v13  ;;  %v1303_v44 = vsub.f32 %v2973_v12, %v1302_v43  ;;  %v1317_v62 = vsub.f32 %v2989_v51, %v1316_v47  ;;  %v1311_v11 = vand.u32 4294901760, %v1310_v55  ;;  %v1324_v13 = vsub.f32 %v3027_v20, %v1323_v16 }
 0x12d   :  { %2275 = vmatpush3.msra.mxu1 %v2735_v60  ;;  %2276 = vmatprep.mubr.msk.f32.mxu1 %vm2520_vm0, %v2519_v0  ;;  %v1296_v60 = vsub.f32 %v2963_v4, %v1295_v25  ;;  %v1283_v2 = vand.u32 4294901760, %v1282_v52  ;;  %v1154_v52 = vld [vmem:[#allocation2 + $0x108] sm:$0xff] }
 0x12e   :  { %2233 = vmatprep.subr.mxu0 %v2519_v0  ;;  %2277 = vmatmul.mubr.f32.vlgmr.msra.gmra.mxu1 %v2765_v21  ;;  %v1304_v61 = vand.u32 4294901760, %v1303_v44  ;;  %v1318_v30 = vand.u32 4294901760, %v1317_v62  ;;  %v1325_v24 = vand.u32 4294901760, %v1324_v13  ;;  %v1153_v44 = vld [vmem:[#allocation2 + $0x100] sm:$0xff] }
 0x12f   :  { %2234 = vmatpush3.msra.mxu0 %v3306_v17  ;;  %2241 = vmatprep.mubr.msk.f32.mxu0 %vm2520_vm0, %v2519_v0  ;;  %v1297_v48 = vand.u32 4294901760, %v1296_v60  ;;  %v1330_v17 = vand.u32 4294901760, %v3036_v54 }
 0x130   :  { %2235 = vmatprep.subr.mxu0 %v2519_v0  ;;  %2314 = vmatprep.subr.mxu1 %v2519_v0 }
 0x131   :  { %2236 = vmatpush3.msra.mxu0 %v3307_v18  ;;  %2346 = vmatprep.mubr.msk.f32.mxu1 %vm2520_vm0, %v2519_v0  ;;  %v3048_v18 = vsub.f32 %v1158_v27, %v3038_v35  ;;  %v1331_v29 = vsub.f32 %v3036_v54, %v1330_v17 }
 0x132   :  { %2237 = vmatprep.subr.mxu0 %v2519_v0  ;;  %2315 = vmatpush3.msra.mxu1 %v1269_v26  ;;  %v3071_v26 = vand.u32 4294901760, %v1155_v42 }
 0x133   :  { %2238 = vmatpush3.msra.mxu0 %v3308_v22  ;;  %2316 = vmatprep.subr.mxu1 %v2519_v0  ;;  %v3050_v22 = vand.u32 4294901760, %v1157_v9  ;;  %v3303_v33 = vand.u32 4294901760, %v3048_v18  ;;  %v1332_v45 = vand.u32 4294901760, %v1331_v29 }
 0x134   :  { %2239 = vmatprep.subr.mxu0 %v2519_v0  ;;  %2317 = vmatpush3.msra.mxu1 %v1276_v59  ;;  %v3082_v60 = vsub.f32 %v1155_v42, %v3071_v26 }
 0x135   :  { %2240 = vmatpush3.msra.mxu0 %v3309_v23  ;;  %2318 = vmatprep.subr.mxu1 %v2519_v0  ;;  %v1156_v23 = vld [vmem:[#allocation2 + $0x118] sm:$0xff]  ;;  %v3060_v36 = vsub.f32 %v1157_v9, %v3050_v22  ;;  %v1338_v46 = vsub.f32 %v3048_v18, %v3303_v33 }
 0x136   :  { %2242 = vmatmul.mubr.f32.vlgmr.msra.gmra.mxu0 %v2765_v21  ;;  %2279 = vmatprep.subr.mxu0 %v2519_v0  ;;  %v1288_v21 = vand.u32 4294901760, %v2960_v3  ;;  %v3064_v37 = vand.u32 4294901760, %v1156_v23  ;;  %v3300_v55 = vand.u32 4294901760, %v3082_v60 }
 0x137   :  { %2311 = vmatprep.mubr.msk.f32.mxu0 %vm2520_vm0, %v2519_v0  ;;  %2280 = vmatpush3.msra.mxu0 %v2932_v28  ;;  %v3302_v7 = vand.u32 4294901760, %v3060_v36 }
 0x138   :  { %2281 = vmatprep.subr.mxu0 %v2519_v0  ;;  %v1289_v58 = vsub.f32 %v2960_v3, %v1288_v21  ;;  %2319 = vmatpush3.msra.mxu1 %v1283_v2  ;;  %v3075_v39 = vsub.f32 %v1156_v23, %v3064_v37  ;;  %v3084_v2 = vand.u32 4294901760, %v1154_v52  ;;  %v1359_v10 = vsub.f32 %v3082_v60, %v3300_v55 }
 0x139   :  { %2282 = vmatpush3.msra.mxu0 %v2937_v32  ;;  %2320 = vmatprep.subr.mxu1 %v2519_v0  ;;  %v1345_v59 = vsub.f32 %v3060_v36, %v3302_v7 }
 0x13a   :  { %2283 = vmatprep.subr.mxu0 %v2519_v0  ;;  %v1290_v34 = vand.u32 4294901760, %v1289_v58  ;;  %v1339_v58 = vand.u32 4294901760, %v1338_v46  ;;  %v3092_v57 = vsub.f32 %v1154_v52, %v3084_v2  ;;  %v1360_v9 = vand.u32 4294901760, %v1359_v10  ;;  %v1821_v10 = vld [vmem:[#allocation2 + $0xa0] ss:$0 sm:$0xff] }
 0x13b   :  { %2284 = vmatpush3.msra.mxu0 %v2940_v38 }
 0x13c   :  { %2285 = vmatprep.subr.mxu0 %v2519_v0  ;;  %2321 = vmatpush3.msra.mxu1 %v1290_v34  ;;  %v3301_v34 = vand.u32 4294901760, %v3075_v39 }
 0x13d   :  { %2286 = vmatpush3.msra.mxu0 %v2942_v40  ;;  %2322 = vmatprep.subr.mxu1 %v2519_v0 }
 0x13e   :  { %2287 = vmatprep.subr.mxu0 %v2519_v0  ;;  %2323 = vmatpush3.msra.mxu1 %v1297_v48  ;;  %v1346_v48 = vand.u32 4294901760, %v1345_v59  ;;  %v1352_v62 = vsub.f32 %v3075_v39, %v3301_v34 }
 0x13f   :  { %2288 = vmatpush3.msra.mxu0 %v2944_v41  ;;  %2324 = vmatprep.subr.mxu1 %v2519_v0 }
 0x140   :  { %2289 = vmatprep.subr.mxu0 %v2519_v0  ;;  %2325 = vmatpush3.msra.mxu1 %v1304_v61  ;;  %v3094_v61 = vand.u32 4294901760, %v1153_v44 }
 0x141   :  { %2290 = vmatpush3.msra.mxu0 %v2952_v53  ;;  %2326 = vmatprep.subr.mxu1 %v2519_v0 }
 0x142   :  { %2291 = vmatprep.subr.mxu0 %v2519_v0  ;;  %2327 = vmatpush3.msra.mxu1 %v1311_v11  ;;  %v3299_v11 = vand.u32 4294901760, %v3092_v57  ;;  %v3107_v27 = vsub.f32 %v1153_v44, %v3094_v61 }
 0x143   :  { %2292 = vmatpush3.msra.mxu0 %v2954_v56  ;;  %2328 = vmatprep.subr.mxu1 %v2519_v0 }
 0x144   :  { %2293 = vmatprep.subr.mxu0 %v2519_v0  ;;  %2329 = vmatpush3.msra.mxu1 %v1318_v30  ;;  %v1353_v30 = vand.u32 4294901760, %v1352_v62  ;;  %v1366_v13 = vsub.f32 %v3092_v57, %v3299_v11  ;;  %v3298_v23 = vand.u32 4294901760, %v3107_v27 }
 0x145   :  { %2294 = vmatpush3.msra.mxu0 %v2966_v6  ;;  %2330 = vmatprep.subr.mxu1 %v2519_v0 }
 0x146   :  { %2295 = vmatprep.subr.mxu0 %v2519_v0  ;;  %2331 = vmatpush3.msra.mxu1 %v1325_v24  ;;  %v1367_v24 = vand.u32 4294901760, %v1366_v13  ;;  %v1373_v29 = vsub.f32 %v3107_v27, %v3298_v23 }
 0x147   :  { %2296 = vmatpush3.msra.mxu0 %v3021_v5  ;;  %2332 = vmatprep.subr.mxu1 %v2519_v0 }
 0x148   :  { %2297 = vmatprep.subr.mxu0 %v2519_v0  ;;  %2333 = vmatpush3.msra.mxu1 %v1332_v45  ;;  %v1374_v42 = vand.u32 4294901760, %v1373_v29 }
 0x149   :  { %2298 = vmatpush3.msra.mxu0 %v3029_v19  ;;  %2334 = vmatprep.subr.mxu1 %v2519_v0 }
 0x14a   :  { %2299 = vmatprep.subr.mxu0 %v2519_v0  ;;  %2335 = vmatpush3.msra.mxu1 %v1339_v58 }
 0x14b   :  { %2300 = vmatpush3.msra.mxu0 %v3038_v35  ;;  %2336 = vmatprep.subr.mxu1 %v2519_v0 }
 0x14c   :  { %2301 = vmatprep.subr.mxu0 %v2519_v0  ;;  %2337 = vmatpush3.msra.mxu1 %v1346_v48 }
 0x14d   :  { %2302 = vmatpush3.msra.mxu0 %v3050_v22  ;;  %2338 = vmatprep.subr.mxu1 %v2519_v0 }
 0x14e   :  { %2303 = vmatprep.subr.mxu0 %v2519_v0  ;;  %2339 = vmatpush3.msra.mxu1 %v1353_v30 }
 0x14f   :  { %2304 = vmatpush3.msra.mxu0 %v3064_v37  ;;  %2340 = vmatprep.subr.mxu1 %v2519_v0 }
 0x150   :  { %2305 = vmatprep.subr.mxu0 %v2519_v0  ;;  %2341 = vmatpush3.msra.mxu1 %v1360_v9 }
 0x151   :  { %2306 = vmatpush3.msra.mxu0 %v3071_v26  ;;  %2342 = vmatprep.subr.mxu1 %v2519_v0 }
 0x152   :  { %2307 = vmatprep.subr.mxu0 %v2519_v0  ;;  %2343 = vmatpush3.msra.mxu1 %v1367_v24 }
 0x153   :  { %2308 = vmatpush3.msra.mxu0 %v3084_v2  ;;  %2344 = vmatprep.subr.mxu1 %v2519_v0 }
 0x154   :  { %2309 = vmatprep.subr.mxu0 %v2519_v0  ;;  %2345 = vmatpush3.msra.mxu1 %v1374_v42 }
 0x155   :  { %2310 = vmatpush3.msra.mxu0 %v3094_v61  ;;  %2384 = vmatprep.subr.mxu1 %v2519_v0 }
 0x156   :  { %2349 = vmatprep.subr.mxu0 %v2519_v0 }
 0x1ac   :  { %v747_v45 = vpop.f32.mrf.mxu1 }
 0x1ae   :  { %v2138_v46 = vpop.f32.mrf.mxu1 }
 0x1b4   :  { %v596_v52 = vpop.f32.mrf.mxu0 }
 0x1b5   :  { %v597_v30 = vadd.f32 %v1821_v10, %v596_v52 }
 0x1b6   :  { %v2103_v58 = vpop.f32.mrf.mxu0 }
 0x1b7   :  { %v748_v13 = vadd.f32 %v747_v45, %v597_v30 }
 0x1cc   :  { %v940_v59 = vpop.f32.mrf.mxu1 }
 0x1ce   :  { %v2208_v44 = vpop.f32.mrf.mxu1 }
 0x1d5   :  { %v851_v48 = vpop.f32.mrf.mxu0 }
 0x1d6   :  { %v852_v29 = vadd.f32 %v851_v48, %v748_v13 }
 0x1d7   :  { %v2173_v62 = vpop.f32.mrf.mxu0 }
 0x1d8   :  { %v941_v24 = vadd.f32 %v940_v59, %v852_v29 }
 0x1ee   :  { %v1146_v9 = vpop.f32.mrf.mxu1 }
 0x1f0   :  { %v2278_v23 = vpop.f32.mrf.mxu1 }
 0x1f6   :  { %v1059_v11 = vpop.f32.mrf.mxu0 }
 0x1f7   :  { %v1060_v55 = vadd.f32 %v1059_v11, %v941_v24 }
 0x1f8   :  { %v2243_v42 = vpop.f32.mrf.mxu0 }
 0x1f9   :  { %v1147_v34 = vadd.f32 %v1146_v9, %v1060_v55 }
 0x1fb   :  { %v1150_v7 = vmax.f32 %v1147_v34, 0.0 }
 0x1fd   :  { %v3124_v33 = vand.u32 4294901760, %v1150_v7 }
 0x1ff   :  { %v3127_v46 = vsub.f32 %v1150_v7, %v3124_v33  ;;  %2347 = vmatmul.mubr.f32.vlgmr.msra.gmra.mxu1 %v3124_v33 }
 0x200   :  { %2385 = vmatpush3.msra.mxu1 %v2932_v28  ;;  %2416 = vmatprep.mubr.msk.f32.mxu1 %vm2520_vm0, %v2519_v0 }
 0x201   :  { %v1256_v23 = vand.u32 4294901760, %v3127_v46  ;;  %2386 = vmatprep.subr.mxu1 %v2519_v0 }
 0x202   :  { %2387 = vmatpush3.msra.mxu1 %v2937_v32 }
 0x203   :  { %2388 = vmatprep.subr.mxu1 %v2519_v0  ;;  %v1257_v34 = vsub.f32 %v3127_v46, %v1256_v23 }
 0x204   :  { %2389 = vmatpush3.msra.mxu1 %v2940_v38 }
 0x205   :  { %2390 = vmatprep.subr.mxu1 %v2519_v0  ;;  %v1258_v7 = vand.u32 4294901760, %v1257_v34 }
 0x206   :  { %2391 = vmatpush3.msra.mxu1 %v2942_v40 }
 0x207   :  { %2392 = vmatprep.subr.mxu1 %v2519_v0  ;;  %2312 = vmatmul.mubr.f32.vlgmr.msra.gmra.mxu0 %v1258_v7 }
 0x208   :  { %2350 = vmatpush3.msra.mxu0 %v2935_v31  ;;  %2393 = vmatpush3.msra.mxu1 %v2944_v41  ;;  %v3311_v31 = vand.u32 4294901760, %v3060_v36 }
 0x209   :  { %2351 = vmatprep.subr.mxu0 %v2519_v0  ;;  %2394 = vmatprep.subr.mxu1 %v2519_v0 }
 0x20a   :  { %2352 = vmatpush3.msra.mxu0 %v2949_v50  ;;  %2395 = vmatpush3.msra.mxu1 %v2952_v53 }
 0x20b   :  { %2353 = vmatprep.subr.mxu0 %v2519_v0  ;;  %2396 = vmatprep.subr.mxu1 %v2519_v0 }
 0x20c   :  { %2354 = vmatpush3.msra.mxu0 %v2957_v1  ;;  %2397 = vmatpush3.msra.mxu1 %v2954_v56 }
 0x20d   :  { %2355 = vmatprep.subr.mxu0 %v2519_v0  ;;  %2398 = vmatprep.subr.mxu1 %v2519_v0 }
 0x20e   :  { %2356 = vmatpush3.msra.mxu0 %v2960_v3  ;;  %2399 = vmatpush3.msra.mxu1 %v2966_v6 }
 0x20f   :  { %2357 = vmatprep.subr.mxu0 %v2519_v0  ;;  %2400 = vmatprep.subr.mxu1 %v2519_v0 }
 0x210   :  { %2358 = vmatpush3.msra.mxu0 %v2963_v4  ;;  %2401 = vmatpush3.msra.mxu1 %v3021_v5 }
 0x211   :  { %2359 = vmatprep.subr.mxu0 %v2519_v0  ;;  %2402 = vmatprep.subr.mxu1 %v2519_v0 }
 0x212   :  { %2360 = vmatpush3.msra.mxu0 %v2973_v12  ;;  %2403 = vmatpush3.msra.mxu1 %v3029_v19 }
 0x213   :  { %2361 = vmatprep.subr.mxu0 %v2519_v0  ;;  %2404 = vmatprep.subr.mxu1 %v2519_v0 }
 0x214   :  { %2362 = vmatpush3.msra.mxu0 %v2977_v14  ;;  %2405 = vmatpush3.msra.mxu1 %v3038_v35 }
 0x215   :  { %2363 = vmatprep.subr.mxu0 %v2519_v0  ;;  %2406 = vmatprep.subr.mxu1 %v2519_v0 }
 0x216   :  { %2364 = vmatpush3.msra.mxu0 %v2989_v51  ;;  %2407 = vmatpush3.msra.mxu1 %v3050_v22 }
 0x217   :  { %2365 = vmatprep.subr.mxu0 %v2519_v0  ;;  %2408 = vmatprep.subr.mxu1 %v2519_v0 }
 0x218   :  { %2366 = vmatpush3.msra.mxu0 %v3027_v20  ;;  %2409 = vmatpush3.msra.mxu1 %v3064_v37 }
 0x219   :  { %2367 = vmatprep.subr.mxu0 %v2519_v0  ;;  %2410 = vmatprep.subr.mxu1 %v2519_v0 }
 0x21a   :  { %2368 = vmatpush3.msra.mxu0 %v3036_v54  ;;  %2411 = vmatpush3.msra.mxu1 %v3071_v26 }
 0x21b   :  { %2369 = vmatprep.subr.mxu0 %v2519_v0  ;;  %2412 = vmatprep.subr.mxu1 %v2519_v0 }
 0x21c   :  { %2370 = vmatpush3.msra.mxu0 %v3048_v18  ;;  %2413 = vmatpush3.msra.mxu1 %v3084_v2 }
 0x21d   :  { %2371 = vmatprep.subr.mxu0 %v2519_v0  ;;  %2414 = vmatprep.subr.mxu1 %v2519_v0 }
 0x21e   :  { %2372 = vmatpush3.msra.mxu0 %v3060_v36  ;;  %2415 = vmatpush3.msra.mxu1 %v3094_v61 }
 0x21f   :  { %2373 = vmatprep.subr.mxu0 %v2519_v0  ;;  %2417 = vmatmul.mubr.f32.vlgmr.msra.gmra.mxu1 %v1256_v23 }
 0x220   :  { %2454 = vmatprep.subr.mxu1 %v2519_v0  ;;  %2374 = vmatpush3.msra.mxu0 %v3075_v39 }
 0x221   :  { %2455 = vmatpush3.msra.mxu1 %v2932_v28  ;;  %2375 = vmatprep.subr.mxu0 %v2519_v0  ;;  %v3310_v28 = vand.u32 4294901760, %v3048_v18 }
 0x222   :  { %2456 = vmatprep.subr.mxu1 %v2519_v0  ;;  %2376 = vmatpush3.msra.mxu0 %v3082_v60 }
 0x223   :  { %2457 = vmatpush3.msra.mxu1 %v2937_v32  ;;  %2377 = vmatprep.subr.mxu0 %v2519_v0  ;;  %v3312_v32 = vand.u32 4294901760, %v3075_v39 }
 0x224   :  { %2458 = vmatprep.subr.mxu1 %v2519_v0  ;;  %2378 = vmatpush3.msra.mxu0 %v3092_v57 }
 0x225   :  { %2459 = vmatpush3.msra.mxu1 %v2940_v38  ;;  %2379 = vmatprep.subr.mxu0 %v2519_v0  ;;  %v3313_v38 = vand.u32 4294901760, %v3082_v60 }
 0x226   :  { %2460 = vmatprep.subr.mxu1 %v2519_v0  ;;  %2380 = vmatpush3.msra.mxu0 %v3107_v27 }
 0x227   :  { %2381 = vmatprep.mubr.msk.f32.mxu0 %vm2520_vm0, %v2519_v0  ;;  %2461 = vmatpush3.msra.mxu1 %v2942_v40  ;;  %v3314_v40 = vand.u32 4294901760, %v3092_v57 }
 0x228   :  { %2382 = vmatmul.mubr.f32.vlgmr.msra.gmra.mxu0 %v3127_v46  ;;  %2419 = vmatprep.subr.mxu0 %v2519_v0 }
 0x229   :  { %2462 = vmatprep.subr.mxu1 %v2519_v0  ;;  %2420 = vmatpush3.msra.mxu0 %v1267_v49 }
 0x22a   :  { %2463 = vmatpush3.msra.mxu1 %v2944_v41  ;;  %2421 = vmatprep.subr.mxu0 %v2519_v0  ;;  %v3315_v41 = vand.u32 4294901760, %v3107_v27 }
 0x22b   :  { %2464 = vmatprep.subr.mxu1 %v2519_v0  ;;  %2422 = vmatpush3.msra.mxu0 %v1274_v8  ;;  %v1822_v8 = vld [vmem:[#allocation2 + $0x120] ss:$0 sm:$0xff] }
 0x22c   :  { %2465 = vmatpush3.msra.mxu1 %v2952_v53  ;;  %2423 = vmatprep.subr.mxu0 %v2519_v0 }
 0x22d   :  { %2466 = vmatprep.subr.mxu1 %v2519_v0  ;;  %2424 = vmatpush3.msra.mxu0 %v1281_v15 }
 0x22e   :  { %2467 = vmatpush3.msra.mxu1 %v2954_v56  ;;  %2425 = vmatprep.subr.mxu0 %v2519_v0 }
 0x22f   :  { %2468 = vmatprep.subr.mxu1 %v2519_v0  ;;  %2426 = vmatpush3.msra.mxu0 %v1288_v21 }
 0x230   :  { %2469 = vmatpush3.msra.mxu1 %v2966_v6  ;;  %2427 = vmatprep.subr.mxu0 %v2519_v0 }
 0x231   :  { %2470 = vmatprep.subr.mxu1 %v2519_v0  ;;  %2428 = vmatpush3.msra.mxu0 %v1295_v25 }
 0x232   :  { %2471 = vmatpush3.msra.mxu1 %v3021_v5  ;;  %2429 = vmatprep.subr.mxu0 %v2519_v0 }
 0x233   :  { %2472 = vmatprep.subr.mxu1 %v2519_v0  ;;  %2430 = vmatpush3.msra.mxu0 %v1302_v43 }
 0x234   :  { %2473 = vmatpush3.msra.mxu1 %v3029_v19  ;;  %2431 = vmatprep.subr.mxu0 %v2519_v0 }
 0x235   :  { %2474 = vmatprep.subr.mxu1 %v2519_v0  ;;  %2432 = vmatpush3.msra.mxu0 %v1309_v63 }
 0x236   :  { %2475 = vmatpush3.msra.mxu1 %v3038_v35  ;;  %2433 = vmatprep.subr.mxu0 %v2519_v0 }
 0x237   :  { %2476 = vmatprep.subr.mxu1 %v2519_v0  ;;  %2434 = vmatpush3.msra.mxu0 %v1316_v47 }
 0x238   :  { %2477 = vmatpush3.msra.mxu1 %v3050_v22  ;;  %2435 = vmatprep.subr.mxu0 %v2519_v0 }
 0x239   :  { %2478 = vmatprep.subr.mxu1 %v2519_v0  ;;  %2436 = vmatpush3.msra.mxu0 %v1323_v16 }
 0x23a   :  { %2479 = vmatpush3.msra.mxu1 %v3064_v37  ;;  %2437 = vmatprep.subr.mxu0 %v2519_v0 }
 0x23b   :  { %2480 = vmatprep.subr.mxu1 %v2519_v0  ;;  %2438 = vmatpush3.msra.mxu0 %v1330_v17 }
 0x23c   :  { %2481 = vmatpush3.msra.mxu1 %v3071_v26  ;;  %2439 = vmatprep.subr.mxu0 %v2519_v0 }
 0x23d   :  { %2482 = vmatprep.subr.mxu1 %v2519_v0  ;;  %2440 = vmatpush3.msra.mxu0 %v3310_v28 }
 0x23e   :  { %2483 = vmatpush3.msra.mxu1 %v3084_v2  ;;  %2441 = vmatprep.subr.mxu0 %v2519_v0 }
 0x23f   :  { %2484 = vmatprep.subr.mxu1 %v2519_v0  ;;  %2442 = vmatpush3.msra.mxu0 %v3311_v31 }
 0x240   :  { %2485 = vmatpush3.msra.mxu1 %v3094_v61  ;;  %2486 = vmatprep.mubr.msk.f32.mxu1 %vm2520_vm0, %v2519_v0 }
 0x241   :  { %2443 = vmatprep.subr.mxu0 %v2519_v0  ;;  %2487 = vmatmul.mubr.f32.vlgmr.msra.gmra.mxu1 %v3124_v33 }
 0x242   :  { %2444 = vmatpush3.msra.mxu0 %v3312_v32  ;;  %2451 = vmatprep.mubr.msk.f32.mxu0 %vm2520_vm0, %v2519_v0 }
 0x243   :  { %2445 = vmatprep.subr.mxu0 %v2519_v0 }
 0x244   :  { %2446 = vmatpush3.msra.mxu0 %v3313_v38 }
 0x245   :  { %2447 = vmatprep.subr.mxu0 %v2519_v0 }
 0x246   :  { %2448 = vmatpush3.msra.mxu0 %v3314_v40 }
 0x247   :  { %2449 = vmatprep.subr.mxu0 %v2519_v0 }
 0x248   :  { %2450 = vmatpush3.msra.mxu0 %v3315_v41 }
 0x249   :  { %2452 = vmatmul.mubr.f32.vlgmr.msra.gmra.mxu0 %v3124_v33 }
 0x2bf   :  { %v1411_v49 = vpop.f32.mrf.mxu1 }
 0x2c1   :  { %v2348_v50 = vpop.f32.mrf.mxu1 }
 0x2c7   :  { %v1260_v53 = vpop.f32.mrf.mxu0 }
 0x2c8   :  { %v1261_v12 = vadd.f32 %v1822_v8, %v1260_v53 }
 0x2c9   :  { %v2313_v56 = vpop.f32.mrf.mxu0 }
 0x2ca   :  { %v1412_v15 = vadd.f32 %v1411_v49, %v1261_v12 }
 0x2df   :  { %v1604_v1 = vpop.f32.mrf.mxu1 }
 0x2e1   :  { %v2418_v3 = vpop.f32.mrf.mxu1 }
 0x2e8   :  { %v1515_v4 = vpop.f32.mrf.mxu0 }
 0x2e9   :  { %v1516_v25 = vadd.f32 %v1515_v4, %v1412_v15 }
 0x2ea   :  { %v2383_v6 = vpop.f32.mrf.mxu0 }
 0x2eb   :  { %v1605_v0 = vadd.f32 %v1604_v1, %v1516_v25 }
 0x301   :  { %v1810_v14 = vpop.f32.mrf.mxu1 }
 0x303   :  { %v2488_v21 = vpop.f32.mrf.mxu1 }
 0x309   :  { %v1723_v43 = vpop.f32.mrf.mxu0 }
 0x30a   :  { %v1724_v51 = vadd.f32 %v1723_v43, %v1605_v0 }
 0x30b   :  { %v2453_v63 = vpop.f32.mrf.mxu0 }
 0x30c   :  { %v1811_v47 = vadd.f32 %v1810_v14, %v1724_v51 }
 0x30e   :  { %1814 = vst.msk [vmem:[%s3291_s2] sm:$0xff] %vm32_vm2, %v1811_v47 }
 0x30f   :  { %1819 = vsyncpa [#allocation3], 1 }

</bundles_post_ra>
